<compile_context>
chip_gen: v7x
topology: tpu7x:2x2x1
jax: 0.10.0
libtpu: 0.0.40
codegen_flags: <defaults>
</compile_context>

<pallas_src>
import jax
import jax.numpy as jnp
from jax import lax
from jax.experimental import pallas as pl
from jax.experimental.pallas import tpu as pltpu


# --------------------------------------------------------------------- kernel
def _fdu_kernel(x_ref, w1s_ref, w2t_ref, o_ref):
    # x_ref / o_ref : (C, HWp) f32 -- one batch element, NCHW with spatial
    #                 flattened and padded to a multiple of 128 lanes.
    # w1s_ref       : (C // r, C)   = fc1_w * (1 / (H*W))   (pool divisor folded)
    # w2t_ref       : (C // r, 2C)  = fc2_w.T               (pre-transposed)
    c = x_ref.shape[0]

    # ---- squeeze-excite chain (tiny, stays VMEM/vreg resident) -------------
    # Per-channel sums over the spatial (lane) axis; padded columns are zero.
    pooled = jnp.sum(x_ref[...], axis=1, keepdims=True)                    # (C, 1)

    # fc1 + ReLU (column mat-vec, C//r outputs -- negligible work).
    h = jnp.maximum(
        jnp.dot(w1s_ref[...], pooled, preferred_element_type=jnp.float32),
        0.0)                                                               # (C//r, 1)

    # fc2 + sigmoid, lane-dense: contract h's dim-0 with w2t's dim-0 so the
    # result is a (1, 2C) row -> sigmoid runs lane-dense on the EUP.
    s = jax.nn.sigmoid(
        lax.dot_general(h, w2t_ref[...],
                        dimension_numbers=(((0,), (0,)), ((), ())),
                        preferred_element_type=jnp.float32))               # (1, 2C)

    # One small transpose back to per-channel columns for the broadcast apply.
    st = jnp.transpose(s)                                                  # (2C, 1)
    y1 = st[:c, :]                                                         # (C, 1) scale
    y2 = st[c:, :]                                                         # (C, 1) shift

    # ---- apply: re-read x from VMEM (don't hold the big tile live across the
    # FC chain); per-channel affine broadcast along the spatial (lane) axis.
    o_ref[...] = x_ref[...] * y1 + y2


# -------------------------------------------------------------------- wrapper
def fdu_forward(params, x_nchw):
    """FDU forward.  x_nchw: (B, C, H, W) float32 -> (B, C, H, W) float32."""
    B, C, H, W = x_nchw.shape
    hw = H * W

    fc1_w = params["fc1_w"]            # (C // reduction, C)
    fc2_w = params["fc2_w"]            # (2 * C, C // reduction)
    # Guard the implicit "fc2 out_features == 2*C" split assumption.
    assert fc1_w.shape[1] == C, fc1_w.shape
    assert fc2_w.shape == (2 * C, fc1_w.shape[0]), fc2_w.shape

    # Fold the average-pool divisor into fc1; pre-transpose fc2 (both tiny).
    w1s = (fc1_w * (1.0 / hw)).astype(jnp.float32)          # (C//r, C)
    w2t = jnp.transpose(fc2_w).astype(jnp.float32)          # (C//r, 2C)

    # Lane-dense slabs: pad flattened spatial dim up to a multiple of 128.
    hw_p = ((hw + 127) // 128) * 128
    x = x_nchw.astype(jnp.float32).reshape(B, C, hw)
    if hw_p != hw:
        x = jnp.pad(x, ((0, 0), (0, 0), (0, hw_p - hw)))

    # VMEM budget: (in + out) blocks, double-buffered, plus weights + headroom.
    block_bytes = C * hw_p * 4
    weight_bytes = (w1s.size + w2t.size) * 4
    vmem_bytes = 4 * block_bytes + 2 * weight_bytes + (4 << 20)
    vmem_bytes = min(max(vmem_bytes, 32 << 20), 100 << 20)

    out = pl.pallas_call(
        _fdu_kernel,
        out_shape=jax.ShapeDtypeStruct((B, C, hw_p), jnp.float32),
        grid=(B,),
        in_specs=[
            # One full (C, HWp) feature map per grid step (batch dim squeezed).
            pl.BlockSpec((None, C, hw_p), lambda b: (b, 0, 0)),
            # Weights replicated across the grid (full-array blocks).
            pl.BlockSpec(w1s.shape, lambda b: (0, 0)),
            pl.BlockSpec(w2t.shape, lambda b: (0, 0)),
        ],
        out_specs=pl.BlockSpec((None, C, hw_p), lambda b: (b, 0, 0)),
        compiler_params=pltpu.CompilerParams(
            dimension_semantics=("parallel",),
            vmem_limit_bytes=vmem_bytes),
    )(x, w1s, w2t)

    if hw_p != hw:
        out = out[:, :, :hw]
    return out.reshape(B, C, H, W)


# ---------------------------------------------------------- pure-JAX reference
def fdu_reference(params, x_nchw):
    B, C, _, _ = x_nchw.shape
    y = jnp.mean(x_nchw, axis=(2, 3))                       # (B, C)
    h = jax.nn.relu(y @ params["fc1_w"].T)                  # (B, C // reduction)
    s = jax.nn.sigmoid(h @ params["fc2_w"].T)               # (B, 2C)
    y1 = s[:, :C].reshape(B, C, 1, 1)
    y2 = s[:, C:].reshape(B, C, 1, 1)
    return x_nchw * y1 + y2


# ------------------------------------------------------------------------ main
if __name__ == "__main__":
    key = jax.random.PRNGKey(0)
    k1, k2, k3 = jax.random.split(key, 3)

    # FDU as used in PFDN: channel = 256, reduction = 16.
    B, C, H, W = 2, 256, 16, 16
    reduction = 16

    params = {
        "fc1_w": jax.random.normal(k1, (C // reduction, C), jnp.float32) * 0.05,
        "fc2_w": jax.random.normal(k2, (2 * C, C // reduction), jnp.float32) * 0.05,
    }
    x = jax.random.normal(k3, (B, C, H, W), jnp.float32)

    fwd = jax.jit(fdu_forward)
    out = jax.block_until_ready(fwd(params, x))

    assert out.shape == (B, C, H, W), out.shape
    assert bool(jnp.all(jnp.isfinite(out)))

    ref = fdu_reference(params, x)
    max_err = float(jnp.max(jnp.abs(out - ref)))
    assert max_err < 1e-4, f"mismatch vs reference: {max_err}"

    print("KERNEL_OK")
</pallas_src>

<mosaic_0001>
module attributes {stable_mosaic.version = 11 : i64} {
  func.func @_fdu_kernel(%arg0: i32, %arg1: memref<1x256x256xf32, #tpu.memory_space<vmem>>, %arg2: memref<16x256xf32, #tpu.memory_space<vmem>>, %arg3: memref<16x512xf32, #tpu.memory_space<vmem>>, %arg4: memref<1x256x256xf32, #tpu.memory_space<vmem>>) attributes {dimension_semantics = [#tpu.dimension_semantics<parallel>], iteration_bounds = array<i64: 2>, scalar_prefetch = 0 : i64, scratch_operands = 0 : i64, tpu.core_type = #tpu.core_type<tc>, window_params = [{transform_indices = @transform_0, window_bounds = array<i64: 1, 256, 256>}, {pipeline_mode = #tpu.pipeline_mode<synchronous>, transform_indices = @transform_1, window_bounds = array<i64: 16, 256>}, {pipeline_mode = #tpu.pipeline_mode<synchronous>, transform_indices = @transform_2, window_bounds = array<i64: 16, 512>}, {transform_indices = @transform_3, window_bounds = array<i64: 1, 256, 256>}]} {
    %c0 = arith.constant 0 : index
    %c0_0 = arith.constant 0 : index
    %c0_1 = arith.constant 0 : index
    %0 = vector.load %arg1[%c0, %c0_0, %c0_1] : memref<1x256x256xf32, #tpu.memory_space<vmem>>, vector<1x256x256xf32>
    %1 = vector.shape_cast %0 : vector<1x256x256xf32> to vector<256x256xf32>
    %cst = arith.constant dense<0.000000e+00> : vector<256xf32>
    %2 = vector.multi_reduction <add>, %1, %cst [1] : vector<256x256xf32> to vector<256xf32>
    %3 = vector.shape_cast %2 : vector<256xf32> to vector<256x1xf32>
    %c0_2 = arith.constant 0 : index
    %c0_3 = arith.constant 0 : index
    %4 = vector.load %arg2[%c0_2, %c0_3] : memref<16x256xf32, #tpu.memory_space<vmem>>, vector<16x256xf32>
    %cst_4 = arith.constant dense<0.000000e+00> : vector<16x1xf32>
    %5 = tpu.matmul %4, %3, %cst_4 {dimension_numbers = #tpu.dot_dimension_numbers<[1], [0], [0], [1], [0, 0, 1, 1], [], []>} : vector<16x256xf32>, vector<256x1xf32>, vector<16x1xf32> -> vector<16x1xf32>
    %cst_5 = arith.constant 0.000000e+00 : f32
    %6 = vector.broadcast %cst_5 : f32 to vector<16x1xf32>
    %7 = arith.maximumf %5, %6 : vector<16x1xf32>
    %c0_6 = arith.constant 0 : index
    %c0_7 = arith.constant 0 : index
    %8 = vector.load %arg3[%c0_6, %c0_7] : memref<16x512xf32, #tpu.memory_space<vmem>>, vector<16x512xf32>
    %cst_8 = arith.constant dense<0.000000e+00> : vector<1x512xf32>
    %9 = tpu.matmul %7, %8, %cst_8 {dimension_numbers = #tpu.dot_dimension_numbers<[0], [0], [1], [1], [0, 1, 1, 1], [], []>} : vector<16x1xf32>, vector<16x512xf32>, vector<1x512xf32> -> vector<1x512xf32>
    %10 = arith.negf %9 : vector<1x512xf32>
    %11 = math.exp %10 : vector<1x512xf32>
    %cst_9 = arith.constant 1.000000e+00 : f32
    %12 = vector.broadcast %cst_9 : f32 to vector<1x512xf32>
    %13 = arith.addf %12, %11 : vector<1x512xf32>
    %14 = arith.divf %12, %13 : vector<1x512xf32>
    %15 = tpu.transpose %14, [1, 0] : vector<1x512xf32> -> vector<512x1xf32>
    %16 = vector.extract_strided_slice %15 {offsets = [0, 0], sizes = [256, 1], strides = [1, 1]} : vector<512x1xf32> to vector<256x1xf32>
    %17 = vector.extract_strided_slice %15 {offsets = [256, 0], sizes = [256, 1], strides = [1, 1]} : vector<512x1xf32> to vector<256x1xf32>
    %c0_10 = arith.constant 0 : index
    %c0_11 = arith.constant 0 : index
    %c0_12 = arith.constant 0 : index
    %18 = vector.load %arg1[%c0_10, %c0_11, %c0_12] : memref<1x256x256xf32, #tpu.memory_space<vmem>>, vector<1x256x256xf32>
    %19 = vector.shape_cast %18 : vector<1x256x256xf32> to vector<256x256xf32>
    %20 = vector.broadcast %16 : vector<256x1xf32> to vector<256x256xf32>
    %21 = arith.mulf %19, %20 : vector<256x256xf32>
    %22 = vector.broadcast %17 : vector<256x1xf32> to vector<256x256xf32>
    %23 = arith.addf %21, %22 : vector<256x256xf32>
    %c0_13 = arith.constant 0 : index
    %c0_14 = arith.constant 0 : index
    %c0_15 = arith.constant 0 : index
    %24 = vector.load %arg4[%c0_13, %c0_14, %c0_15] : memref<1x256x256xf32, #tpu.memory_space<vmem>>, vector<1x256x256xf32>
    %25 = vector.shape_cast %24 : vector<1x256x256xf32> to vector<256x256xf32>
    %26 = vector.shape_cast %23 : vector<256x256xf32> to vector<1x256x256xf32>
    tpu.vector_store %arg4[%c0_13, %c0_14, %c0_15], %26 {strides = array<i32>} : memref<1x256x256xf32, #tpu.memory_space<vmem>>, vector<1x256x256xf32>,
    return
  }
  func.func @transform_0(%arg0: i32) -> (i32, i32, i32) {
    %c0_i32 = arith.constant 0 : i32
    %c0_i32_0 = arith.constant 0 : i32
    %c0_i32_1 = arith.constant 0 : i32
    return %arg0, %c0_i32, %c0_i32_0 : i32, i32, i32
  }
  func.func @transform_1(%arg0: i32) -> (i32, i32) {
    %c0_i32 = arith.constant 0 : i32
    %c0_i32_0 = arith.constant 0 : i32
    %c0_i32_1 = arith.constant 0 : i32
    return %c0_i32, %c0_i32_0 : i32, i32
  }
  func.func @transform_2(%arg0: i32) -> (i32, i32) {
    %c0_i32 = arith.constant 0 : i32
    %c0_i32_0 = arith.constant 0 : i32
    %c0_i32_1 = arith.constant 0 : i32
    return %c0_i32, %c0_i32_0 : i32, i32
  }
  func.func @transform_3(%arg0: i32) -> (i32, i32, i32) {
    %c0_i32 = arith.constant 0 : i32
    %c0_i32_0 = arith.constant 0 : i32
    %c0_i32_1 = arith.constant 0 : i32
    return %arg0, %c0_i32, %c0_i32_0 : i32, i32, i32
  }
}

</mosaic_0001>

<bundles_post_ra>
// kernel: fdu_forward.1
= control target key start
LH: loop header
LB: loop body
LE: loop exit
PB: predicated region body
PF: predicated region fallthrough
CT: control target
= control target key end

     0   :  { %s1478_s12 = smov 0   ;;  %s1947_s0 = inlined_call_operand.vmem [shape: f32[2,256,256], index: 0, kind: input, shape index: {}]   ;;  %s1948_s1 = inlined_call_operand.vmem [shape: f32[16,256], index: 1, kind: input, shape index: {}]   ;;  %s1949_s2 = inlined_call_operand.vmem [shape: f32[16,512], index: 2, kind: input, shape index: {}]   ;;  %s1950_s3 = inlined_call_operand.vmem [shape: f32[2,256,256], index: 3, kind: output, shape index: {}]  }
   0x1 LB: > { %s1317_s13 = sadd.s32 4294967295, %s1454_s12   ;;  %p1321_p0 = scmp.ge.s32.totalorder %s1454_s12, 1  ;;  %s1454_s12 = sphi %s1478_s12, %s13_s12  }
   0x2   : > { %p137_p1 = scmp.lt.s32.totalorder %s1454_s12, 3 }
   0x4   : > { %p138_p2 = pnand %p1321_p0, %p137_p1 }
   0x6   : > { %141 = sbr.rel (%p138_p2) target bundleno = 1261 (0x4ed), region = 32 }
   0xd   : > { %p161_p3 = scmp.lt.s32.totalorder %s1317_s13, 1  ;;  %vm452_vm0 = vcmask 130048  }
   0xf   : > { %s2042_s13 = smov (!%p161_p3, %s1317_s13), 1 }
  0x10   : > { %s1334_s14 = sshll.u32 %s2042_s13, 9 }
  0x11   : > { %s1494_s17 = scalar_lea.vmem %s1947_s0, %s1334_s14  ;;  %s1816_s21 = scalar_lea.vmem %s1950_s3, %s1334_s14 }
  0x12   : > { %v1497_v0 = vld [vmem:[%s1494_s17 + $0x100] sm:$0xff]  ;;  %v1500_v1 = vld [vmem:[%s1494_s17 + $0x108] sm:$0xff]  ;;  %v1511_v5 = vld [vmem:[%s1494_s17 + $0x110] sm:$0xff] }
  0x13   : > { %v1503_v2 = vld [vmem:[%s1494_s17] sm:$0xff]  ;;  %v283_v3 = vadd.f32 %v1500_v1, %v1497_v0  ;;  %v1508_v4 = vld [vmem:[%s1494_s17 + $0x8] sm:$0xff]  ;;  %v1514_v6 = vld [vmem:[%s1494_s17 + $0x118] sm:$0xff] }
  0x14   : > { %v235_v7 = vadd.f32 %v1508_v4, %v1503_v2  ;;  %v1519_v8 = vld [vmem:[%s1494_s17 + $0x10] sm:$0xff]  ;;  %v1522_v9 = vld [vmem:[%s1494_s17 + $0x18] sm:$0xff]  ;;  %v286_v10 = vadd.f32 %v1514_v6, %v1511_v5  ;;  %v1529_v12 = vld [vmem:[%s1494_s17 + $0x120] sm:$0xff] }
  0x15   : > { %284 = vadd.xlane.f32.xlu0 %v283_v3  ;;  %v238_v11 = vadd.f32 %v1522_v9, %v1519_v8  ;;  %v1532_v13 = vld [vmem:[%s1494_s17 + $0x128] sm:$0xff]  ;;  %v1535_v14 = vld [vmem:[%s1494_s17 + $0x130] sm:$0xff]  ;;  %v1538_v15 = vld [vmem:[%s1494_s17 + $0x138] sm:$0xff] }
  0x16   : > { %236 = vadd.xlane.f32.xlu1 %v235_v7  ;;  %v289_v16 = vadd.f32 %v1532_v13, %v1529_v12  ;;  %v292_v17 = vadd.f32 %v1538_v15, %v1535_v14  ;;  %v1545_v18 = vld [vmem:[%s1494_s17 + $0x20] sm:$0xff]  ;;  %v1548_v19 = vld [vmem:[%s1494_s17 + $0x28] sm:$0xff]  ;;  %v1551_v20 = vld [vmem:[%s1494_s17 + $0x30] sm:$0xff] }
  0x17   : > { %v1554_v21 = vld [vmem:[%s1494_s17 + $0x38] sm:$0xff]  ;;  %v241_v22 = vadd.f32 %v1548_v19, %v1545_v18  ;;  %v1561_v24 = vld [vmem:[%s1494_s17 + $0x140] sm:$0xff]  ;;  %v1564_v25 = vld [vmem:[%s1494_s17 + $0x148] sm:$0xff] }
  0x18   : > { %v244_v23 = vadd.f32 %v1554_v21, %v1551_v20  ;;  %v1567_v26 = vld [vmem:[%s1494_s17 + $0x150] sm:$0xff]  ;;  %v1570_v27 = vld [vmem:[%s1494_s17 + $0x158] sm:$0xff]  ;;  %v295_v28 = vadd.f32 %v1564_v25, %v1561_v24  ;;  %v1577_v30 = vld [vmem:[%s1494_s17 + $0x40] sm:$0xff] }
  0x19   : > { %287 = vadd.xlane.f32.xlu0 %v286_v10  ;;  %v298_v29 = vadd.f32 %v1570_v27, %v1567_v26  ;;  %v1580_v31 = vld [vmem:[%s1494_s17 + $0x48] sm:$0xff]  ;;  %v1583_v32 = vld [vmem:[%s1494_s17 + $0x50] sm:$0xff]  ;;  %v1586_v33 = vld [vmem:[%s1494_s17 + $0x58] sm:$0xff] }
  0x1a   : > { %239 = vadd.xlane.f32.xlu1 %v238_v11  ;;  %v247_v34 = vadd.f32 %v1580_v31, %v1577_v30  ;;  %v250_v35 = vadd.f32 %v1586_v33, %v1583_v32  ;;  %v1593_v36 = vld [vmem:[%s1494_s17 + $0x160] sm:$0xff]  ;;  %v1596_v37 = vld [vmem:[%s1494_s17 + $0x168] sm:$0xff]  ;;  %v1599_v38 = vld [vmem:[%s1494_s17 + $0x170] sm:$0xff] }
  0x1b   : > { %1981 = vst [vmem:[#allocation2_spill] sm:$0xff] %v1599_v38  ;;  %v1602_v39 = vld [vmem:[%s1494_s17 + $0x178] sm:$0xff]  ;;  %v301_v40 = vadd.f32 %v1596_v37, %v1593_v36  ;;  %v1609_v42 = vld [vmem:[%s1494_s17 + $0x60] sm:$0xff]  ;;  %v1612_v43 = vld [vmem:[%s1494_s17 + $0x68] sm:$0xff] }
  0x1c   : > { %1982 = vst [vmem:[#allocation3_spill] sm:$0xff] %v1602_v39  ;;  %v304_v41 = vadd.f32 %v1602_v39, %v1599_v38  ;;  %v1615_v44 = vld [vmem:[%s1494_s17 + $0x70] sm:$0xff]  ;;  %v1618_v45 = vld [vmem:[%s1494_s17 + $0x78] sm:$0xff]  ;;  %v253_v46 = vadd.f32 %v1612_v43, %v1609_v42  ;;  %v1625_v48 = vld [vmem:[%s1494_s17 + $0x180] sm:$0xff] }
  0x1d   : > { %290 = vadd.xlane.f32.xlu0 %v289_v16  ;;  %1983 = vst [vmem:[#allocation4_spill] sm:$0xff] %v1615_v44  ;;  %1984 = vst [vmem:[#allocation5_spill] sm:$0xff] %v1618_v45  ;;  %v256_v47 = vadd.f32 %v1618_v45, %v1615_v44  ;;  %v1628_v49 = vld [vmem:[%s1494_s17 + $0x188] sm:$0xff]  ;;  %v1631_v50 = vld [vmem:[%s1494_s17 + $0x190] sm:$0xff] }
  0x1e   : > { %293 = vadd.xlane.f32.xlu1 %v292_v17  ;;  %1985 = vst [vmem:[#allocation6_spill] sm:$0xff] %v1625_v48  ;;  %1986 = vst [vmem:[#allocation7_spill] sm:$0xff] %v1628_v49  ;;  %v1634_v51 = vld [vmem:[%s1494_s17 + $0x198] sm:$0xff]  ;;  %v307_v52 = vadd.f32 %v1628_v49, %v1625_v48  ;;  %v1641_v54 = vld [vmem:[%s1494_s17 + $0x80] sm:$0xff] }
  0x1f   : > { %1987 = vst [vmem:[#allocation8_spill] sm:$0xff] %v1631_v50  ;;  %1988 = vst [vmem:[#allocation9_spill] sm:$0xff] %v1634_v51  ;;  %v310_v53 = vadd.f32 %v1634_v51, %v1631_v50  ;;  %v1644_v55 = vld [vmem:[%s1494_s17 + $0x88] sm:$0xff]  ;;  %v1647_v56 = vld [vmem:[%s1494_s17 + $0x90] sm:$0xff] }
  0x20   : > { %1989 = vst [vmem:[#allocation10_spill] sm:$0xff] %v1641_v54  ;;  %1990 = vst [vmem:[#allocation11_spill] sm:$0xff] %v1644_v55  ;;  %v1650_v57 = vld [vmem:[%s1494_s17 + $0x98] sm:$0xff]  ;;  %v259_v58 = vadd.f32 %v1644_v55, %v1641_v54  ;;  %v1657_v60 = vld [vmem:[%s1494_s17 + $0x1a0] sm:$0xff] }
  0x21   : > { %242 = vadd.xlane.f32.xlu0 %v241_v22  ;;  %1991 = vst [vmem:[#allocation12_spill] sm:$0xff] %v1647_v56  ;;  %1992 = vst [vmem:[#allocation13_spill] sm:$0xff] %v1650_v57  ;;  %v262_v59 = vadd.f32 %v1650_v57, %v1647_v56  ;;  %v1660_v61 = vld [vmem:[%s1494_s17 + $0x1a8] sm:$0xff]  ;;  %v1663_v62 = vld [vmem:[%s1494_s17 + $0x1b0] sm:$0xff] }
  0x22   : > { %245 = vadd.xlane.f32.xlu1 %v244_v23  ;;  %1993 = vst [vmem:[#allocation14_spill] sm:$0xff] %v1657_v60  ;;  %1994 = vst [vmem:[#allocation15_spill] sm:$0xff] %v1660_v61  ;;  %v1666_v63 = vld [vmem:[%s1494_s17 + $0x1b8] sm:$0xff]  ;;  %v313_v3 = vadd.f32 %v1660_v61, %v1657_v60  ;;  %v1673_v10 = vld [vmem:[%s1494_s17 + $0xa0] sm:$0xff] }
  0x23   : > { %1995 = vst [vmem:[#allocation16_spill] sm:$0xff] %v1663_v62  ;;  %1996 = vst [vmem:[#allocation17_spill] sm:$0xff] %v1666_v63  ;;  %v316_v7 = vadd.f32 %v1666_v63, %v1663_v62  ;;  %v1676_v11 = vld [vmem:[%s1494_s17 + $0xa8] sm:$0xff]  ;;  %v1679_v16 = vld [vmem:[%s1494_s17 + $0xb0] sm:$0xff] }
  0x24   : > { %1997 = vst [vmem:[#allocation18_spill] sm:$0xff] %v1673_v10  ;;  %1998 = vst [vmem:[#allocation19_spill] sm:$0xff] %v1676_v11  ;;  %v1682_v17 = vld [vmem:[%s1494_s17 + $0xb8] sm:$0xff]  ;;  %v265_v22 = vadd.f32 %v1676_v11, %v1673_v10 }
  0x25   : > { %296 = vadd.xlane.f32.xlu0 %v295_v28  ;;  %1999 = vst [vmem:[#allocation20_spill] sm:$0xff] %v1679_v16  ;;  %2000 = vst [vmem:[#allocation21_spill] sm:$0xff] %v1682_v17  ;;  %v268_v23 = vadd.f32 %v1682_v17, %v1679_v16  ;;  %v1689_v28 = vld [vmem:[%s1494_s17 + $0x1c0] sm:$0xff] }
  0x26   : > { %299 = vadd.xlane.f32.xlu1 %v298_v29  ;;  %2001 = vst [vmem:[#allocation22_spill] sm:$0xff] %v1689_v28  ;;  %v1692_v29 = vld [vmem:[%s1494_s17 + $0x1c8] sm:$0xff] }
  0x27   : > { %2002 = vst [vmem:[#allocation23_spill] sm:$0xff] %v1692_v29 }
  0x29   : > { %248 = vadd.xlane.f32.xlu0 %v247_v34  ;;  %v229_v34 = vld [vmem:[%s1494_s17 + $0x1d0] sm:$0xff] }
  0x2a   : > { %251 = vadd.xlane.f32.xlu1 %v250_v35  ;;  %v230_v35 = vld [vmem:[%s1494_s17 + $0x1d8] sm:$0xff] }
  0x2d   : > { %302 = vadd.xlane.f32.xlu0 %v301_v40  ;;  %v319_v40 = vadd.f32 %v1692_v29, %v1689_v28  ;;  %v1728_v29 = vld [vmem:[%s1494_s17 + $0xe8] sm:$0xff]  ;;  %v202_v28 = vld [vmem:[%s1494_s17 + $0xf8] sm:$0xff] }
  0x2e   : > { %305 = vadd.xlane.f32.xlu1 %v304_v41  ;;  %v322_v41 = vadd.f32 %v230_v35, %v229_v34  ;;  %2010 = vst [vmem:[#allocation31_spill] sm:$0xff] %v1728_v29 }
  0x31   : > { %254 = vadd.xlane.f32.xlu0 %v253_v46  ;;  %v1699_v46 = vld [vmem:[%s1494_s17 + $0xc0] sm:$0xff] }
  0x32   : > { %257 = vadd.xlane.f32.xlu1 %v256_v47  ;;  %2003 = vst [vmem:[#allocation24_spill] sm:$0xff] %v1699_v46  ;;  %v1702_v47 = vld [vmem:[%s1494_s17 + $0xc8] sm:$0xff] }
  0x33   : > { %2004 = vst [vmem:[#allocation25_spill] sm:$0xff] %v1702_v47 }
  0x35   : > { %308 = vadd.xlane.f32.xlu0 %v307_v52  ;;  %v1705_v52 = vld [vmem:[%s1494_s17 + $0xd0] sm:$0xff] }
  0x36   : > { %311 = vadd.xlane.f32.xlu1 %v310_v53  ;;  %2005 = vst [vmem:[#allocation26_spill] sm:$0xff] %v1705_v52  ;;  %v1708_v53 = vld [vmem:[%s1494_s17 + $0xd8] sm:$0xff] }
  0x37   : > { %2006 = vst [vmem:[#allocation27_spill] sm:$0xff] %v1708_v53 }
  0x39   : > { %260 = vadd.xlane.f32.xlu0 %v259_v58  ;;  %v271_v58 = vadd.f32 %v1702_v47, %v1699_v46 }
  0x3a   : > { %263 = vadd.xlane.f32.xlu1 %v262_v59  ;;  %v274_v59 = vadd.f32 %v1708_v53, %v1705_v52 }
  0x3d   : > { %314 = vadd.xlane.f32.xlu0 %v313_v3  ;;  %v1715_v3 = vld [vmem:[%s1494_s17 + $0x1e0] sm:$0xff] }
  0x3e   : > { %317 = vadd.xlane.f32.xlu1 %v316_v7  ;;  %2007 = vst [vmem:[#allocation28_spill] sm:$0xff] %v1715_v3  ;;  %v1718_v7 = vld [vmem:[%s1494_s17 + $0x1e8] sm:$0xff] }
  0x3f   : > { %2008 = vst [vmem:[#allocation29_spill] sm:$0xff] %v1718_v7  ;;  %v325_v34 = vadd.f32 %v1718_v7, %v1715_v3 }
  0x41   : > { %266 = vadd.xlane.f32.xlu0 %v265_v22  ;;  %v233_v22 = vld [vmem:[%s1494_s17 + $0x1f0] sm:$0xff] }
  0x42   : > { %269 = vadd.xlane.f32.xlu1 %v268_v23  ;;  %v234_v23 = vld [vmem:[%s1494_s17 + $0x1f8] sm:$0xff] }
  0x43   : > { %v328_v35 = vadd.f32 %v234_v23, %v233_v22 }
  0x45   : > { %320 = vadd.xlane.f32.xlu0 %v319_v40  ;;  %v1725_v40 = vld [vmem:[%s1494_s17 + $0xe0] sm:$0xff] }
  0x46   : > { %323 = vadd.xlane.f32.xlu1 %v322_v41  ;;  %2009 = vst [vmem:[#allocation30_spill] sm:$0xff] %v1725_v40  ;;  %v201_v41 = vld [vmem:[%s1494_s17 + $0xf0] sm:$0xff]  ;;  %v277_v53 = vadd.f32 %v1728_v29, %v1725_v40 }
  0x47   : > { %v280_v52 = vadd.f32 %v202_v28, %v201_v41 }
  0x49   : > { %272 = vadd.xlane.f32.xlu0 %v271_v58  ;;  %v332_v58 = vld [vmem:[%s1948_s1 + $0x8] sm:$0xff] }
  0x4a   : > { %275 = vadd.xlane.f32.xlu1 %v274_v59  ;;  %399 = vmatprep.mubr.f32.mxu0 %v332_v58 }
  0x4d   : > { %326 = vadd.xlane.f32.xlu0 %v325_v34 }
  0x4e   : > { %329 = vadd.xlane.f32.xlu1 %v328_v35 }
  0x51   : > { %278 = vadd.xlane.f32.xlu0 %v277_v53 }
  0x52   : > { %281 = vadd.xlane.f32.xlu1 %v280_v52 }
  0xa2   : > { %v285_v59 = vpop.xlane.xlu0 %284 }
  0xa3   : > { %v237_v22 = vpop.xlane.xlu1 %236 }
  0xa6   : > { %v288_v23 = vpop.xlane.xlu0 %287 }
  0xa7   : > { %v240_v7 = vpop.xlane.xlu1 %239  ;;  %v1374_v3 = vpack.c.bf16 %v288_v23, %v285_v59 }
  0xa8   : > { %v1376_v63 = vpack.c.bf16 %v240_v7, %v237_v22 }
  0xa9   : > { %1375 = vmatprep.subr.bf16.mxu0 %v1374_v3 }
  0xaa   : > { %v291_v34 = vpop.xlane.xlu0 %290  ;;  %1377 = vmatpush3.bf16.msra.mxu0 %v1376_v63 }
  0xab   : > { %v294_v62 = vpop.xlane.xlu1 %293 }
  0xac   : > { %v1378_v29 = vpack.c.bf16 %v294_v62, %v291_v34 }
  0xae   : > { %1379 = vmatprep.subr.bf16.mxu0 %v1378_v29  ;;  %v243_v28 = vpop.xlane.xlu0 %242 }
  0xaf   : > { %v246_v53 = vpop.xlane.xlu1 %245 }
  0xb0   : > { %v1380_v52 = vpack.c.bf16 %v246_v53, %v243_v28 }
  0xb2   : > { %1381 = vmatpush3.bf16.msra.mxu0 %v1380_v52  ;;  %v297_v35 = vpop.xlane.xlu0 %296 }
  0xb3   : > { %v300_v41 = vpop.xlane.xlu1 %299 }
  0xb4   : > { %v1382_v40 = vpack.c.bf16 %v300_v41, %v297_v35 }
  0xb6   : > { %1383 = vmatprep.subr.bf16.mxu0 %v1382_v40  ;;  %v249_v58 = vpop.xlane.xlu0 %248 }
  0xb7   : > { %v252_v47 = vpop.xlane.xlu1 %251 }
  0xb8   : > { %v1384_v46 = vpack.c.bf16 %v252_v47, %v249_v58 }
  0xba   : > { %1385 = vmatpush3.bf16.msra.mxu0 %v1384_v46  ;;  %v303_v59 = vpop.xlane.xlu0 %302 }
  0xbb   : > { %v306_v7 = vpop.xlane.xlu1 %305 }
  0xbc   : > { %v1386_v3 = vpack.c.bf16 %v306_v7, %v303_v59 }
  0xbe   : > { %1387 = vmatprep.subr.bf16.mxu0 %v1386_v3  ;;  %v255_v63 = vpop.xlane.xlu0 %254 }
  0xbf   : > { %v258_v22 = vpop.xlane.xlu1 %257 }
  0xc0   : > { %v1388_v62 = vpack.c.bf16 %v258_v22, %v255_v63 }
  0xc2   : > { %1389 = vmatpush3.bf16.msra.mxu0 %v1388_v62  ;;  %v309_v29 = vpop.xlane.xlu0 %308 }
  0xc3   : > { %v312_v23 = vpop.xlane.xlu1 %311 }
  0xc4   : > { %v1390_v34 = vpack.c.bf16 %v312_v23, %v309_v29 }
  0xc6   : > { %1391 = vmatprep.subr.bf16.mxu0 %v1390_v34  ;;  %v261_v28 = vpop.xlane.xlu0 %260 }
  0xc7   : > { %v264_v53 = vpop.xlane.xlu1 %263 }
  0xc8   : > { %v1392_v52 = vpack.c.bf16 %v264_v53, %v261_v28 }
  0xca   : > { %1393 = vmatpush3.bf16.msra.mxu0 %v1392_v52  ;;  %v315_v40 = vpop.xlane.xlu0 %314 }
  0xcb   : > { %v318_v35 = vpop.xlane.xlu1 %317 }
  0xcc   : > { %v1394_v47 = vpack.c.bf16 %v318_v35, %v315_v40  ;;  %v331_v40 = vld [vmem:[%s1948_s1] sm:$0xff]  ;;  %v334_v35 = vld [vmem:[%s1948_s1 + $0x18] sm:$0xff] }
  0xce   : > { %1395 = vmatprep.subr.bf16.mxu0 %v1394_v47  ;;  %v267_v46 = vpop.xlane.xlu0 %266  ;;  %v333_v47 = vld [vmem:[%s1948_s1 + $0x10] sm:$0xff] }
  0xcf   : > { %v270_v41 = vpop.xlane.xlu1 %269 }
  0xd0   : > { %v1396_v58 = vpack.c.bf16 %v270_v41, %v267_v46  ;;  %v413_v46 = vld [vmem:[%s1949_s2 + $0x8] sm:$0xff] }
  0xd1   : > { %v417_v41 = vld [vmem:[%s1949_s2 + $0x28] sm:$0xff] }
  0xd2   : > { %1397 = vmatpush3.bf16.msra.mxu0 %v1396_v58  ;;  %v321_v59 = vpop.xlane.xlu0 %320  ;;  %v412_v58 = vld [vmem:[%s1949_s2] sm:$0xff] }
  0xd3   : > { %v324_v7 = vpop.xlane.xlu1 %323 }
  0xd4   : > { %v1398_v3 = vpack.c.bf16 %v324_v7, %v321_v59  ;;  %v1406_v59 = vpack.c.bf16 %v417_v41, %v413_v46  ;;  %v416_v7 = vld [vmem:[%s1949_s2 + $0x20] sm:$0xff]  ;;  %v414_v46 = vld [vmem:[%s1949_s2 + $0x10] sm:$0xff] }
  0xd5   : > { %v418_v41 = vld [vmem:[%s1949_s2 + $0x30] sm:$0xff] }
  0xd6   : > { %1399 = vmatprep.subr.bf16.mxu0 %v1398_v3  ;;  %v273_v63 = vpop.xlane.xlu0 %272  ;;  %v1456_v3 = vmov 0.0   ;;  %1407 = vmatprep.subr.bf16.mxu1 %v1406_v59 }
  0xd7   : > { %v276_v22 = vpop.xlane.xlu1 %275  ;;  %520 = vmatprep.mubr.f32.mxu1 %v1456_v3 }
  0xd8   : > { %v1400_v62 = vpack.c.bf16 %v276_v22, %v273_v63  ;;  %v1408_v63 = vpack.c.bf16 %v416_v7, %v412_v58  ;;  %v1412_v58 = vpack.c.bf16 %v418_v41, %v414_v46 }
  0xda   : > { %1401 = vmatpush3.bf16.msra.mxu0 %v1400_v62  ;;  %v327_v29 = vpop.xlane.xlu0 %326  ;;  %1409 = vmatpush1.bf16.msra.mxu1 %v1408_v63 }
  0xdb   : > { %v330_v23 = vpop.xlane.xlu1 %329 }
  0xdc   : > { %v1402_v34 = vpack.c.bf16 %v330_v23, %v327_v29 }
  0xde   : > { %1403 = vmatprep.subr.bf16.mxu0 %v1402_v34  ;;  %v279_v28 = vpop.xlane.xlu0 %278 }
  0xdf   : > { %v282_v53 = vpop.xlane.xlu1 %281 }
  0xe0   : > { %v1404_v52 = vpack.c.bf16 %v282_v53, %v279_v28  ;;  %v415_v28 = vld [vmem:[%s1949_s2 + $0x18] sm:$0xff] }
  0xe1   : > { %v419_v53 = vld [vmem:[%s1949_s2 + $0x38] sm:$0xff] }
  0xe2   : > { %1405 = vmatpush3.bf16.msra.mxu0 %v1404_v52 }
  0xe5   : > { %400 = vmatmul.mubr.f32.vlgmr.msra.gmra.mrb[0].mxu0 %v331_v40  ;;  %v1410_v40 = vpack.c.bf16 %v419_v53, %v415_v28 }
  0xe6   : > { %404 = vmatprep.mubr.f32.mxu0 %v334_v35 }
  0xe7   : > { %1411 = vmatprep.subr.bf16.mxu1 %v1410_v40 }
  0xe9   : > { %405 = vmatmul.mubr.f32.gmra.mrb[2].mxu0 %v333_v47 }
 0x1b8   : > { %v1368_v22 = vpop.f32.mrb[0].mxu0 }
 0x1b9   : > { %v1369_v62 = vpop.f32.mrb[1].mxu0 }
 0x1ba   : > { %v1370_v29 = vadd.f32 %v1369_v62, %v1368_v22 }
 0x1bc   : > { %v410_v23 = vmax.f32 %v1370_v29, 0.0  ;;  %v1371_v34 = vpop.f32.mrb[2].mxu0 }
 0x1bd   : > { %v1372_v52 = vpop.f32.mrb[3].mxu0 }
 0x1be   : > { %v1373_v35 = vadd.f32 %v1372_v52, %v1371_v34  ;;  %420 = vxpose.xlu0.b32.start [1/2] (short) (narrow) %v410_v23, 8 }
 0x1c0   : > { %v411_v47 = vmax.f32 %v1373_v35, 0.0 }
 0x1c2   : > { %421 = vxpose.xlu0.b32.end [2/2] (short) (narrow) %v411_v47, 8 }
 0x23e   : > { %v436_v59 = vpop.trf.xlu0 }
 0x23f   : > { %1326 = vmatmul.mubr.msk.f32.vlgmr.msra.gmra.mrb[0].mxu1 %vm452_vm0, %v436_v59 }
 0x240   : > { %1413 = vmatpush1.bf16.msra.mxu1 %v1412_v58  ;;  %591 = vmatprep.mubr.f32.mxu1 %v1456_v3 }
 0x243   : > { %1327 = vmatmul.mubr.msk.f32.vlgmr.msra.gmra.mrb[2].mxu1 %vm452_vm0, %v436_v59 }
 0x312   : > { %v522_v7 = vpop.f32.mrb[0].mxu1 }
 0x313   : > { %v1328_v63 = vmul.f32 -1.442695, %v522_v7  ;;  %v524_v22 = vpop.f32.mrb[1].mxu1 }
 0x314   : > { %v1329_v62 = vmul.f32 -1.442695, %v524_v22  ;;  %v1457_v22 = vmov 0  }
 0x315   : > { %1426 = vpow2.f32 %v1328_v63 }
 0x316   : > { %1428 = vpow2.f32 %v1329_v62  ;;  %v593_v29 = vpop.f32.mrb[2].mxu1 }
 0x317   : > { %v595_v23 = vpop.f32.mrb[3].mxu1  ;;  %v1330_v3 = vmul.f32 -1.442695, %v593_v29 }
 0x318   : > { %v1331_v47 = vmul.f32 -1.442695, %v595_v23 }
 0x31f   : > { %v1427_v34 = vpop.eup %1426 }
 0x320   : > { %v1429_v28 = vpop.eup %1428  ;;  %v610_v53 = vadd.f32 1.0, %v1427_v34 }
 0x321   : > { %v611_v52 = vadd.f32 1.0, %v1429_v28 }
 0x322   : > { %1430 = vrcp.f32 %v610_v53 }
 0x323   : > { %1432 = vrcp.f32 %v611_v52 }
 0x324   : > { %1434 = vpow2.f32 %v1330_v3 }
 0x325   : > { %1436 = vpow2.f32 %v1331_v47 }
 0x32c   : > { %v1431_v40 = vpop.eup %1430 }
 0x32d   : > { %v1433_v35 = vpop.eup %1432  ;;  %622 = vxpose.xlu1.b32.start.end [1/1] (short) %v1431_v40, 128 }
 0x32e   : > { %654 = vxpose.xlu0.b32.start.end [1/1] (short) %v1433_v35, 128  ;;  %v1435_v46 = vpop.eup %1434 }
 0x32f   : > { %v1437_v41 = vpop.eup %1436  ;;  %v612_v58 = vadd.f32 1.0, %v1435_v46 }
 0x330   : > { %v613_v59 = vadd.f32 1.0, %v1437_v41 }
 0x331   : > { %1438 = vrcp.f32 %v612_v58 }
 0x332   : > { %1440 = vrcp.f32 %v613_v59 }
 0x33b   : > { %v1439_v7 = vpop.eup %1438 }
 0x33c   : > { %v1441_v63 = vpop.eup %1440 }
 0x36a   : > { %686 = vxpose.xlu1.b32.start.end [1/1] (short) %v1439_v7, 128 }
 0x36b   : > { %718 = vxpose.xlu0.b32.start.end [1/1] (short) %v1441_v63, 128 }
 0x388   : > { %1424 = vset.pattern.permute.xlu1 %v1457_v22 }
 0x394   : > { %1425 = vset.pattern.permute.xlu0 %v1457_v22 }
 0x3ad   : > { %v638_v62 = vpop.trf.xlu1 }
 0x3ae   : > { %v670_v34 = vpop.trf.xlu0 }
 0x3b1   : > { %v639_v28 = vpop.trf.xlu1 }
 0x3b2   : > { %v671_v29 = vpop.trf.xlu0 }
 0x3b5   : > { %v640_v23 = vpop.trf.xlu1 }
 0x3b6   : > { %v672_v53 = vpop.trf.xlu0 }
 0x3b9   : > { %v641_v52 = vpop.trf.xlu1 }
 0x3ba   : > { %v673_v40 = vpop.trf.xlu0 }
 0x3bd   : > { %v642_v35 = vpop.trf.xlu1 }
 0x3be   : > { %v674_v3 = vpop.trf.xlu0 }
 0x3c1   : > { %v643_v47 = vpop.trf.xlu1 }
 0x3c2   : > { %v675_v46 = vpop.trf.xlu0 }
 0x3c4   : > { %752 = vperm.xlu1 %1424, %v638_v62  }
 0x3c5   : > { %v644_v41 = vpop.trf.xlu1 }
 0x3c6   : > { %v676_v58 = vpop.trf.xlu0 }
 0x3c8   : > { %837 = vperm.xlu1 %1424, %v671_v29  }
 0x3c9   : > { %v645_v59 = vpop.trf.xlu1 }
 0x3ca   : > { %v677_v7 = vpop.trf.xlu0 }
 0x3cc   : > { %762 = vperm.xlu1 %1424, %v640_v23  }
 0x3cd   : > { %v646_v63 = vpop.trf.xlu1 }
 0x3ce   : > { %v678_v22 = vpop.trf.xlu0 }
 0x3d0   : > { %832 = vperm.xlu0 %1425, %v670_v34  }
 0x3d1   : > { %v1770_v17 = vpop.trf.xlu1 }
 0x3d2   : > { %v1772_v16 = vpop.trf.xlu0 }
 0x3d4   : > { %757 = vperm.xlu0 %1425, %v639_v28  }
 0x3d5   : > { %v648_v61 = vpop.trf.xlu1 }
 0x3d6   : > { %v1774_v60 = vpop.trf.xlu0 }
 0x3d9   : > { %v1776_v51 = vpop.trf.xlu1 }
 0x3da   : > { %v1778_v62 = vpop.trf.xlu0 }
 0x3dd   : > { %v1780_v50 = vpop.trf.xlu1 }
 0x3de   : > { %v1782_v29 = vpop.trf.xlu0 }
 0x3e1   : > { %v1784_v23 = vpop.trf.xlu1 }
 0x3e2   : > { %v1786_v11 = vpop.trf.xlu0 }
 0x3e5   : > { %v1788_v34 = vpop.trf.xlu1 }
 0x3e6   : > { %v1790_v10 = vpop.trf.xlu0 }
 0x3e9   : > { %v1792_v28 = vpop.trf.xlu1 }
 0x3ea   : > { %v1794_v57 = vpop.trf.xlu0 }
 0x3ed   : > { %v702_v56 = vpop.trf.xlu1 }
 0x3ee   : > { %976 = vperm.xlu0 %1425, %v702_v56   ;;  %v734_v49 = vpop.trf.xlu0 }
 0x3f1   : > { %v703_v48 = vpop.trf.xlu1 }
 0x3f2   : > { %981 = vperm.xlu1 %1424, %v703_v48   ;;  %1056 = vperm.xlu0 %1425, %v734_v49   ;;  %v735_v39 = vpop.trf.xlu0 }
 0x3f5   : > { %v704_v38 = vpop.trf.xlu1 }
 0x3f6   : > { %842 = vperm.xlu0 %1425, %v672_v53   ;;  %1061 = vperm.xlu1 %1424, %v735_v39   ;;  %v736_v55 = vpop.trf.xlu0 }
 0x3f9   : > { %v705_v54 = vpop.trf.xlu1 }
 0x3fa   : > { %986 = vperm.xlu0 %1425, %v704_v38   ;;  %767 = vperm.xlu1 %1424, %v641_v52   ;;  %v737_v45 = vpop.trf.xlu0 }
 0x3fd   : > { %v706_v44 = vpop.trf.xlu1 }
 0x3fe   : > { %847 = vperm.xlu1 %1424, %v673_v40   ;;  %1066 = vperm.xlu0 %1425, %v736_v55   ;;  %v738_v56 = vpop.trf.xlu0 }
 0x401   : > { %v707_v48 = vpop.trf.xlu1 }
 0x402   : > { %772 = vperm.xlu1 %1424, %v642_v35   ;;  %852 = vperm.xlu0 %1425, %v674_v3   ;;  %v739_v39 = vpop.trf.xlu0 }
 0x405   : > { %v708_v38 = vpop.trf.xlu1 }
 0x406   : > { %991 = vperm.xlu1 %1424, %v705_v54   ;;  %996 = vperm.xlu0 %1425, %v706_v44   ;;  %v740_v49 = vpop.trf.xlu0 }
 0x409   : > { %v709_v55 = vpop.trf.xlu1 }
 0x40a   : > { %1071 = vperm.xlu1 %1424, %v737_v45   ;;  %1076 = vperm.xlu0 %1425, %v738_v56   ;;  %v741_v54 = vpop.trf.xlu0 }
 0x40d   : > { %v710_v44 = vpop.trf.xlu1 }
 0x40e   : > { %777 = vperm.xlu1 %1424, %v643_v47   ;;  %782 = vperm.xlu0 %1425, %v644_v41   ;;  %v742_v45 = vpop.trf.xlu0 }
 0x411   : > { %v711_v53 = vpop.trf.xlu1 }
 0x412   : > { %857 = vperm.xlu1 %1424, %v675_v46   ;;  %862 = vperm.xlu0 %1425, %v676_v58   ;;  %v743_v52 = vpop.trf.xlu0 }
 0x415   : > { %v712_v40 = vpop.trf.xlu1 }
 0x416   : > { %1001 = vperm.xlu1 %1424, %v707_v48   ;;  %1006 = vperm.xlu0 %1425, %v708_v38   ;;  %v744_v35 = vpop.trf.xlu0 }
 0x419   : > { %v713_v3 = vpop.trf.xlu1 }
 0x41a   : > { %1081 = vperm.xlu1 %1424, %v739_v39   ;;  %1086 = vperm.xlu0 %1425, %v740_v49  }
 0x41e   : > { %787 = vperm.xlu1 %1424, %v645_v59   ;;  %792 = vperm.xlu0 %1425, %v646_v63  }
 0x422   : > { %867 = vperm.xlu1 %1424, %v677_v7   ;;  %872 = vperm.xlu0 %1425, %v678_v22  }
 0x426   : > { %1011 = vperm.xlu1 %1424, %v709_v55   ;;  %1016 = vperm.xlu0 %1425, %v710_v44  }
 0x42a   : > { %1091 = vperm.xlu1 %1424, %v741_v54   ;;  %1096 = vperm.xlu0 %1425, %v742_v45  }
 0x42e   : > { %797 = vperm.xlu1 %1424, %v1770_v17   ;;  %802 = vperm.xlu0 %1425, %v648_v61   ;;  %v745_v61 = vpop.trf.xlu0 }
 0x432   : > { %877 = vperm.xlu1 %1424, %v1772_v16   ;;  %882 = vperm.xlu0 %1425, %v1774_v60   ;;  %v714_v16 = vpop.trf.xlu1  ;;  %v746_v60 = vpop.trf.xlu0 }
 0x436   : > { %1021 = vperm.xlu1 %1424, %v711_v53   ;;  %1026 = vperm.xlu0 %1425, %v712_v40   ;;  %v715_v17 = vpop.trf.xlu1 }
 0x43a   : > { %1101 = vperm.xlu1 %1424, %v743_v52   ;;  %1106 = vperm.xlu0 %1425, %v744_v35  }
 0x43e   : > { %807 = vperm.xlu1 %1424, %v1776_v51   ;;  %812 = vperm.xlu0 %1425, %v1780_v50   ;;  %v747_v51 = vpop.trf.xlu0  ;;  %v716_v50 = vpop.trf.xlu1 }
 0x442   : > { %887 = vperm.xlu1 %1424, %v1778_v62   ;;  %892 = vperm.xlu0 %1425, %v1782_v29   ;;  %v748_v47 = vpop.trf.xlu0  ;;  %v717_v46 = vpop.trf.xlu1 }
 0x446   : > { %1031 = vperm.xlu1 %1424, %v713_v3   ;;  %1036 = vperm.xlu0 %1425, %v714_v16   ;;  %v749_v41 = vpop.trf.xlu0  ;;  %v753_v58 = vpop.permute.xlu1 %752 }
 0x447   : > { %v911_v63 = vmul.f32 %v753_v58, %v1508_v4 }
 0x44a   : > { %1111 = vperm.xlu1 %1424, %v745_v61   ;;  %1116 = vperm.xlu0 %1425, %v746_v60   ;;  %v838_v7 = vpop.permute.xlu1 %837 }
 0x44b   : > { %v945_v55 = vmul.f32 %v838_v7, %v1514_v6 }
 0x44e   : > { %817 = vperm.xlu1 %1424, %v1784_v23   ;;  %822 = vperm.xlu0 %1425, %v1788_v34   ;;  %v763_v22 = vpop.permute.xlu1 %762 }
 0x44f   : > { %v833_v59 = vpop.permute.xlu0 %832  ;;  %v914_v44 = vmul.f32 %v763_v22, %v1545_v18  ;;  %v915_v45 = vmul.f32 %v763_v22, %v1548_v19 }
 0x450   : > { %v942_v23 = vmul.f32 %v833_v59, %v1497_v0  ;;  %v944_v0 = vmul.f32 %v838_v7, %v1511_v5 }
 0x452   : > { %897 = vperm.xlu1 %1424, %v1786_v11   ;;  %902 = vperm.xlu0 %1425, %v1790_v10   ;;  %v910_v10 = vmul.f32 %v753_v58, %v1503_v2  ;;  %v943_v2 = vmul.f32 %v833_v59, %v1500_v1 }
 0x453   : > { %v758_v11 = vpop.permute.xlu0 %757 }
 0x454   : > { %v912_v4 = vmul.f32 %v758_v11, %v1519_v8  ;;  %v913_v34 = vmul.f32 %v758_v11, %v1522_v9 }
 0x456   : > { %1041 = vperm.xlu1 %1424, %v715_v17   ;;  %1046 = vperm.xlu0 %1425, %v716_v50  }
 0x45a   : > { %1121 = vperm.xlu1 %1424, %v747_v51   ;;  %1126 = vperm.xlu0 %1425, %v748_v47  }
 0x45e   : > { %827 = vperm.xlu1 %1424, %v1792_v28  }
 0x462   : > { %907 = vperm.xlu1 %1424, %v1794_v57  }
 0x466   : > { %1051 = vperm.xlu1 %1424, %v717_v46  }
 0x46a   : > { %1131 = vperm.xlu1 %1424, %v749_v41  }
 0x46d   : > { %v977_v62 = vpop.permute.xlu0 %976 }
 0x46e   : > { %v1134_v57 = vadd.f32 %v977_v62, %v910_v10  ;;  %v1135_v29 = vadd.f32 %v977_v62, %v911_v63 }
 0x470   : > { %1198 = vst [vmem:[%s1816_s21] sm:$0xff] %v1134_v57  ;;  %1199 = vst [vmem:[%s1816_s21 + $0x8] sm:$0xff] %v1135_v29 }
 0x471   : > { %v982_v28 = vpop.permute.xlu1 %981  ;;  %v1057_v56 = vpop.permute.xlu0 %1056 }
 0x472   : > { %v1136_v48 = vadd.f32 %v982_v28, %v912_v4  ;;  %v1137_v39 = vadd.f32 %v982_v28, %v913_v34  ;;  %v1166_v38 = vadd.f32 %v1057_v56, %v942_v23  ;;  %v1167_v49 = vadd.f32 %v1057_v56, %v943_v2 }
 0x474   : > { %1200 = vst [vmem:[%s1816_s21 + $0x10] sm:$0xff] %v1136_v48  ;;  %1201 = vst [vmem:[%s1816_s21 + $0x18] sm:$0xff] %v1137_v39 }
 0x475   : > { %1230 = vst [vmem:[%s1816_s21 + $0x100] sm:$0xff] %v1166_v38  ;;  %1231 = vst [vmem:[%s1816_s21 + $0x108] sm:$0xff] %v1167_v49  ;;  %v1062_v1 = vpop.permute.xlu1 %1061  ;;  %v843_v8 = vpop.permute.xlu0 %842 }
 0x476   : > { %v1168_v9 = vadd.f32 %v1062_v1, %v944_v0  ;;  %v1169_v54 = vadd.f32 %v1062_v1, %v945_v55  ;;  %v946_v40 = vmul.f32 %v843_v8, %v1529_v12  ;;  %v947_v35 = vmul.f32 %v843_v8, %v1532_v13 }
 0x478   : > { %1232 = vst [vmem:[%s1816_s21 + $0x110] sm:$0xff] %v1168_v9  ;;  %1233 = vst [vmem:[%s1816_s21 + $0x118] sm:$0xff] %v1169_v54 }
 0x479   : > { %v768_v5 = vpop.permute.xlu1 %767  ;;  %v987_v6 = vpop.permute.xlu0 %986 }
 0x47a   : > { %v1138_v53 = vadd.f32 %v987_v6, %v914_v44  ;;  %v1139_v52 = vadd.f32 %v987_v6, %v915_v45  ;;  %v916_v17 = vmul.f32 %v768_v5, %v1551_v20  ;;  %v917_v51 = vmul.f32 %v768_v5, %v1554_v21  ;;  %v2012_v44 = vld [vmem:[#allocation5_spill] sm:$0xff]  ;;  %v2013_v5 = vld [vmem:[#allocation10_spill] sm:$0xff] }
 0x47c   : > { %1202 = vst [vmem:[%s1816_s21 + $0x20] sm:$0xff] %v1138_v53  ;;  %1203 = vst [vmem:[%s1816_s21 + $0x28] sm:$0xff] %v1139_v52  ;;  %v2014_v53 = vld [vmem:[#allocation11_spill] sm:$0xff] }
 0x47d   : > { %v848_v3 = vpop.permute.xlu1 %847  ;;  %v1067_v61 = vpop.permute.xlu0 %1066 }
 0x47e   : > { %v1170_v16 = vadd.f32 %v1067_v61, %v946_v40  ;;  %v1171_v18 = vadd.f32 %v1067_v61, %v947_v35  ;;  %v948_v7 = vmul.f32 %v848_v3, %v1535_v14  ;;  %v949_v20 = vmul.f32 %v848_v3, %v1538_v15 }
 0x480   : > { %1234 = vst [vmem:[%s1816_s21 + $0x120] sm:$0xff] %v1170_v16  ;;  %1235 = vst [vmem:[%s1816_s21 + $0x128] sm:$0xff] %v1171_v18 }
 0x481   : > { %v773_v19 = vpop.permute.xlu1 %772  ;;  %v853_v60 = vpop.permute.xlu0 %852 }
 0x482   : > { %v918_v12 = vmul.f32 %v773_v19, %v1577_v30  ;;  %v919_v13 = vmul.f32 %v773_v19, %v1580_v31  ;;  %v950_v21 = vmul.f32 %v853_v60, %v1561_v24  ;;  %v951_v30 = vmul.f32 %v853_v60, %v1564_v25  ;;  %v2015_v19 = vld [vmem:[#allocation2_spill] sm:$0xff] }
 0x485   : > { %v992_v50 = vpop.permute.xlu1 %991  ;;  %v997_v47 = vpop.permute.xlu0 %996 }
 0x486   : > { %v1140_v46 = vadd.f32 %v992_v50, %v916_v17  ;;  %v1141_v41 = vadd.f32 %v992_v50, %v917_v51  ;;  %v1142_v58 = vadd.f32 %v997_v47, %v918_v12  ;;  %v1143_v59 = vadd.f32 %v997_v47, %v919_v13  ;;  %v2016_v17 = vld [vmem:[#allocation3_spill] sm:$0xff]  ;;  %v2017_v12 = vld [vmem:[#allocation6_spill] sm:$0xff] }
 0x487   : > { %v2018_v50 = vld [vmem:[#allocation7_spill] sm:$0xff] }
 0x488   : > { %1204 = vst [vmem:[%s1816_s21 + $0x30] sm:$0xff] %v1140_v46  ;;  %1205 = vst [vmem:[%s1816_s21 + $0x38] sm:$0xff] %v1141_v41 }
 0x489   : > { %1206 = vst [vmem:[%s1816_s21 + $0x40] sm:$0xff] %v1142_v58  ;;  %1207 = vst [vmem:[%s1816_s21 + $0x48] sm:$0xff] %v1143_v59  ;;  %v1072_v31 = vpop.permute.xlu1 %1071  ;;  %v1077_v11 = vpop.permute.xlu0 %1076 }
 0x48a   : > { %v1172_v10 = vadd.f32 %v1072_v31, %v948_v7  ;;  %v1173_v63 = vadd.f32 %v1072_v31, %v949_v20  ;;  %v1174_v22 = vadd.f32 %v1077_v11, %v950_v21  ;;  %v1175_v62 = vadd.f32 %v1077_v11, %v951_v30 }
 0x48c   : > { %1236 = vst [vmem:[%s1816_s21 + $0x130] sm:$0xff] %v1172_v10  ;;  %1237 = vst [vmem:[%s1816_s21 + $0x138] sm:$0xff] %v1173_v63  ;;  %v2019_v10 = vld [vmem:[#allocation12_spill] sm:$0xff] }
 0x48d   : > { %1238 = vst [vmem:[%s1816_s21 + $0x140] sm:$0xff] %v1174_v22  ;;  %1239 = vst [vmem:[%s1816_s21 + $0x148] sm:$0xff] %v1175_v62  ;;  %v778_v14 = vpop.permute.xlu1 %777  ;;  %v783_v15 = vpop.permute.xlu0 %782  ;;  %v2020_v22 = vld [vmem:[#allocation13_spill] sm:$0xff] }
 0x48e   : > { %v920_v25 = vmul.f32 %v778_v14, %v1583_v32  ;;  %v921_v29 = vmul.f32 %v778_v14, %v1586_v33  ;;  %v922_v23 = vmul.f32 %v783_v15, %v1609_v42  ;;  %v923_v2 = vmul.f32 %v783_v15, %v1612_v43  ;;  %v2021_v14 = vld [vmem:[#allocation18_spill] sm:$0xff] }
 0x491   : > { %v858_v57 = vpop.permute.xlu1 %857  ;;  %v863_v24 = vpop.permute.xlu0 %862 }
 0x492   : > { %v952_v38 = vmul.f32 %v858_v57, %v1567_v26  ;;  %v953_v32 = vmul.f32 %v858_v57, %v1570_v27  ;;  %v954_v33 = vmul.f32 %v863_v24, %v1593_v36  ;;  %v955_v42 = vmul.f32 %v863_v24, %v1596_v37  ;;  %v2011_v37 = vld [vmem:[#allocation4_spill] sm:$0xff]  ;;  %v2022_v57 = vld [vmem:[#allocation19_spill] sm:$0xff] }
 0x495   : > { %v1002_v4 = vpop.permute.xlu1 %1001  ;;  %v1007_v34 = vpop.permute.xlu0 %1006 }
 0x496   : > { %v1144_v28 = vadd.f32 %v1002_v4, %v920_v25  ;;  %v1145_v56 = vadd.f32 %v1002_v4, %v921_v29  ;;  %v1146_v48 = vadd.f32 %v1007_v34, %v922_v23  ;;  %v1147_v39 = vadd.f32 %v1007_v34, %v923_v2 }
 0x498   : > { %1208 = vst [vmem:[%s1816_s21 + $0x50] sm:$0xff] %v1144_v28  ;;  %1209 = vst [vmem:[%s1816_s21 + $0x58] sm:$0xff] %v1145_v56  ;;  %v2023_v28 = vld [vmem:[#allocation8_spill] sm:$0xff] }
 0x499   : > { %1210 = vst [vmem:[%s1816_s21 + $0x60] sm:$0xff] %v1146_v48  ;;  %1211 = vst [vmem:[%s1816_s21 + $0x68] sm:$0xff] %v1147_v39  ;;  %v1082_v43 = vpop.permute.xlu1 %1081  ;;  %v1087_v49 = vpop.permute.xlu0 %1086  ;;  %v2024_v48 = vld [vmem:[#allocation9_spill] sm:$0xff] }
 0x49a   : > { %v1176_v0 = vadd.f32 %v1082_v43, %v952_v38  ;;  %v1177_v55 = vadd.f32 %v1082_v43, %v953_v32  ;;  %v1178_v1 = vadd.f32 %v1087_v49, %v954_v33  ;;  %v1179_v8 = vadd.f32 %v1087_v49, %v955_v42  ;;  %v2025_v38 = vld [vmem:[#allocation14_spill] sm:$0xff]  ;;  %v2026_v33 = vld [vmem:[#allocation15_spill] sm:$0xff] }
 0x49c   : > { %1240 = vst [vmem:[%s1816_s21 + $0x150] sm:$0xff] %v1176_v0  ;;  %1241 = vst [vmem:[%s1816_s21 + $0x158] sm:$0xff] %v1177_v55 }
 0x49d   : > { %1242 = vst [vmem:[%s1816_s21 + $0x160] sm:$0xff] %v1178_v1  ;;  %1243 = vst [vmem:[%s1816_s21 + $0x168] sm:$0xff] %v1179_v8  ;;  %v788_v26 = vpop.permute.xlu1 %787  ;;  %v793_v27 = vpop.permute.xlu0 %792 }
 0x49e   : > { %v924_v54 = vmul.f32 %v788_v26, %v2011_v37  ;;  %v925_v45 = vmul.f32 %v788_v26, %v2012_v44  ;;  %v926_v6 = vmul.f32 %v793_v27, %v2013_v5  ;;  %v927_v52 = vmul.f32 %v793_v27, %v2014_v53  ;;  %v2027_v37 = vld [vmem:[#allocation20_spill] sm:$0xff]  ;;  %v2028_v44 = vld [vmem:[#allocation21_spill] sm:$0xff] }
 0x49f   : > { %v2029_v5 = vld [vmem:[#allocation24_spill] sm:$0xff]  ;;  %v2030_v53 = vld [vmem:[#allocation25_spill] sm:$0xff] }
 0x4a1   : > { %v868_v9 = vpop.permute.xlu1 %867  ;;  %v873_v36 = vpop.permute.xlu0 %872 }
 0x4a2   : > { %v956_v60 = vmul.f32 %v868_v9, %v2015_v19  ;;  %v957_v51 = vmul.f32 %v868_v9, %v2016_v17  ;;  %v958_v13 = vmul.f32 %v873_v36, %v2017_v12  ;;  %v959_v47 = vmul.f32 %v873_v36, %v2018_v50  ;;  %v2031_v19 = vld [vmem:[#allocation16_spill] sm:$0xff]  ;;  %v2032_v17 = vld [vmem:[#allocation17_spill] sm:$0xff]  ;;  %v2033_v12 = vld [vmem:[#allocation22_spill] sm:$0xff] }
 0x4a3   : > { %v2034_v50 = vld [vmem:[#allocation23_spill] sm:$0xff] }
 0x4a5   : > { %v1012_v40 = vpop.permute.xlu1 %1011  ;;  %v1017_v35 = vpop.permute.xlu0 %1016 }
 0x4a6   : > { %v1148_v3 = vadd.f32 %v1012_v40, %v924_v54  ;;  %v1149_v61 = vadd.f32 %v1012_v40, %v925_v45  ;;  %v1150_v16 = vadd.f32 %v1017_v35, %v926_v6  ;;  %v1151_v18 = vadd.f32 %v1017_v35, %v927_v52 }
 0x4a8   : > { %1212 = vst [vmem:[%s1816_s21 + $0x70] sm:$0xff] %v1148_v3  ;;  %1213 = vst [vmem:[%s1816_s21 + $0x78] sm:$0xff] %v1149_v61 }
 0x4a9   : > { %1214 = vst [vmem:[%s1816_s21 + $0x80] sm:$0xff] %v1150_v16  ;;  %1215 = vst [vmem:[%s1816_s21 + $0x88] sm:$0xff] %v1151_v18  ;;  %v1092_v46 = vpop.permute.xlu1 %1091  ;;  %v1097_v41 = vpop.permute.xlu0 %1096 }
 0x4aa   : > { %v1180_v58 = vadd.f32 %v1092_v46, %v956_v60  ;;  %v1181_v59 = vadd.f32 %v1092_v46, %v957_v51  ;;  %v1182_v7 = vadd.f32 %v1097_v41, %v958_v13  ;;  %v1183_v20 = vadd.f32 %v1097_v41, %v959_v47 }
 0x4ac   : > { %1244 = vst [vmem:[%s1816_s21 + $0x170] sm:$0xff] %v1180_v58  ;;  %1245 = vst [vmem:[%s1816_s21 + $0x178] sm:$0xff] %v1181_v59 }
 0x4ad   : > { %1246 = vst [vmem:[%s1816_s21 + $0x180] sm:$0xff] %v1182_v7  ;;  %1247 = vst [vmem:[%s1816_s21 + $0x188] sm:$0xff] %v1183_v20  ;;  %v798_v21 = vpop.permute.xlu1 %797  ;;  %v803_v30 = vpop.permute.xlu0 %802 }
 0x4ae   : > { %v928_v63 = vmul.f32 %v798_v21, %v2019_v10  ;;  %v929_v62 = vmul.f32 %v798_v21, %v2020_v22  ;;  %v930_v15 = vmul.f32 %v803_v30, %v2021_v14  ;;  %v931_v24 = vmul.f32 %v803_v30, %v2022_v57  ;;  %v2035_v10 = vld [vmem:[#allocation26_spill] sm:$0xff]  ;;  %v2036_v22 = vld [vmem:[#allocation27_spill] sm:$0xff] }
 0x4af   : > { %v2037_v14 = vld [vmem:[#allocation30_spill] sm:$0xff]  ;;  %v2038_v57 = vld [vmem:[#allocation31_spill] sm:$0xff] }
 0x4b1   : > { %v878_v31 = vpop.permute.xlu1 %877  ;;  %v883_v11 = vpop.permute.xlu0 %882 }
 0x4b2   : > { %v960_v56 = vmul.f32 %v878_v31, %v2023_v28  ;;  %v961_v39 = vmul.f32 %v878_v31, %v2024_v48  ;;  %v962_v32 = vmul.f32 %v883_v11, %v2025_v38  ;;  %v963_v42 = vmul.f32 %v883_v11, %v2026_v33  ;;  %v1442_v28 = vld [vmem:[%s1494_s17 + $0x1d0] sm:$0xff]  ;;  %v1443_v48 = vld [vmem:[%s1494_s17 + $0x1d8] sm:$0xff] }
 0x4b3   : > { %v2039_v38 = vld [vmem:[#allocation28_spill] sm:$0xff]  ;;  %v2040_v33 = vld [vmem:[#allocation29_spill] sm:$0xff] }
 0x4b5   : > { %v1022_v25 = vpop.permute.xlu1 %1021  ;;  %v1027_v29 = vpop.permute.xlu0 %1026 }
 0x4b6   : > { %v1152_v23 = vadd.f32 %v1022_v25, %v928_v63  ;;  %v1153_v2 = vadd.f32 %v1022_v25, %v929_v62  ;;  %v1154_v4 = vadd.f32 %v1027_v29, %v930_v15  ;;  %v1155_v34 = vadd.f32 %v1027_v29, %v931_v24 }
 0x4b8   : > { %1216 = vst [vmem:[%s1816_s21 + $0x90] sm:$0xff] %v1152_v23  ;;  %1217 = vst [vmem:[%s1816_s21 + $0x98] sm:$0xff] %v1153_v2 }
 0x4b9   : > { %1218 = vst [vmem:[%s1816_s21 + $0xa0] sm:$0xff] %v1154_v4  ;;  %1219 = vst [vmem:[%s1816_s21 + $0xa8] sm:$0xff] %v1155_v34  ;;  %v1102_v43 = vpop.permute.xlu1 %1101  ;;  %v1107_v49 = vpop.permute.xlu0 %1106 }
 0x4ba   : > { %v1184_v0 = vadd.f32 %v1102_v43, %v960_v56  ;;  %v1185_v55 = vadd.f32 %v1102_v43, %v961_v39  ;;  %v1186_v1 = vadd.f32 %v1107_v49, %v962_v32  ;;  %v1187_v8 = vadd.f32 %v1107_v49, %v963_v42 }
 0x4bc   : > { %1248 = vst [vmem:[%s1816_s21 + $0x190] sm:$0xff] %v1184_v0  ;;  %1249 = vst [vmem:[%s1816_s21 + $0x198] sm:$0xff] %v1185_v55 }
 0x4bd   : > { %1250 = vst [vmem:[%s1816_s21 + $0x1a0] sm:$0xff] %v1186_v1  ;;  %1251 = vst [vmem:[%s1816_s21 + $0x1a8] sm:$0xff] %v1187_v8  ;;  %v808_v26 = vpop.permute.xlu1 %807  ;;  %v813_v27 = vpop.permute.xlu0 %812 }
 0x4be   : > { %v932_v54 = vmul.f32 %v808_v26, %v2027_v37  ;;  %v933_v45 = vmul.f32 %v808_v26, %v2028_v44  ;;  %v934_v6 = vmul.f32 %v813_v27, %v2029_v5  ;;  %v935_v52 = vmul.f32 %v813_v27, %v2030_v53  ;;  %v1445_v37 = vld [vmem:[%s1494_s17 + $0xf8] sm:$0xff] }
 0x4c1   : > { %v888_v9 = vpop.permute.xlu1 %887  ;;  %v893_v36 = vpop.permute.xlu0 %892 }
 0x4c2   : > { %v964_v60 = vmul.f32 %v888_v9, %v2031_v19  ;;  %v965_v51 = vmul.f32 %v888_v9, %v2032_v17  ;;  %v966_v13 = vmul.f32 %v893_v36, %v2033_v12  ;;  %v967_v47 = vmul.f32 %v893_v36, %v2034_v50  ;;  %v1444_v9 = vld [vmem:[%s1494_s17 + $0xf0] sm:$0xff] }
 0x4c5   : > { %v1032_v40 = vpop.permute.xlu1 %1031  ;;  %v1037_v35 = vpop.permute.xlu0 %1036 }
 0x4c6   : > { %v1156_v3 = vadd.f32 %v1032_v40, %v932_v54  ;;  %v1157_v61 = vadd.f32 %v1032_v40, %v933_v45  ;;  %v1158_v16 = vadd.f32 %v1037_v35, %v934_v6  ;;  %v1159_v18 = vadd.f32 %v1037_v35, %v935_v52  ;;  %v1446_v6 = vld [vmem:[%s1494_s17 + $0x1f0] sm:$0xff]  ;;  %v1447_v52 = vld [vmem:[%s1494_s17 + $0x1f8] sm:$0xff] }
 0x4c8   : > { %1220 = vst [vmem:[%s1816_s21 + $0xb0] sm:$0xff] %v1156_v3  ;;  %1221 = vst [vmem:[%s1816_s21 + $0xb8] sm:$0xff] %v1157_v61 }
 0x4c9   : > { %1222 = vst [vmem:[%s1816_s21 + $0xc0] sm:$0xff] %v1158_v16  ;;  %1223 = vst [vmem:[%s1816_s21 + $0xc8] sm:$0xff] %v1159_v18  ;;  %v1112_v46 = vpop.permute.xlu1 %1111  ;;  %v1117_v41 = vpop.permute.xlu0 %1116 }
 0x4ca   : > { %v1188_v58 = vadd.f32 %v1112_v46, %v964_v60  ;;  %v1189_v59 = vadd.f32 %v1112_v46, %v965_v51  ;;  %v1190_v7 = vadd.f32 %v1117_v41, %v966_v13  ;;  %v1191_v20 = vadd.f32 %v1117_v41, %v967_v47 }
 0x4cc   : > { %1252 = vst [vmem:[%s1816_s21 + $0x1b0] sm:$0xff] %v1188_v58  ;;  %1253 = vst [vmem:[%s1816_s21 + $0x1b8] sm:$0xff] %v1189_v59 }
 0x4cd   : > { %1254 = vst [vmem:[%s1816_s21 + $0x1c0] sm:$0xff] %v1190_v7  ;;  %1255 = vst [vmem:[%s1816_s21 + $0x1c8] sm:$0xff] %v1191_v20  ;;  %v818_v21 = vpop.permute.xlu1 %817  ;;  %v823_v30 = vpop.permute.xlu0 %822 }
 0x4ce   : > { %v936_v63 = vmul.f32 %v818_v21, %v2035_v10  ;;  %v937_v62 = vmul.f32 %v818_v21, %v2036_v22  ;;  %v938_v15 = vmul.f32 %v823_v30, %v2037_v14  ;;  %v939_v24 = vmul.f32 %v823_v30, %v2038_v57 }
 0x4d1   : > { %v898_v31 = vpop.permute.xlu1 %897  ;;  %v903_v11 = vpop.permute.xlu0 %902 }
 0x4d2   : > { %v968_v56 = vmul.f32 %v1442_v28, %v898_v31  ;;  %v969_v39 = vmul.f32 %v1443_v48, %v898_v31  ;;  %v970_v32 = vmul.f32 %v903_v11, %v2039_v38  ;;  %v971_v42 = vmul.f32 %v903_v11, %v2040_v33 }
 0x4d5   : > { %v1042_v25 = vpop.permute.xlu1 %1041  ;;  %v1047_v29 = vpop.permute.xlu0 %1046 }
 0x4d6   : > { %v1160_v23 = vadd.f32 %v1042_v25, %v936_v63  ;;  %v1161_v2 = vadd.f32 %v1042_v25, %v937_v62  ;;  %v1162_v4 = vadd.f32 %v1047_v29, %v938_v15  ;;  %v1163_v34 = vadd.f32 %v1047_v29, %v939_v24 }
 0x4d8   : > { %1224 = vst [vmem:[%s1816_s21 + $0xd0] sm:$0xff] %v1160_v23  ;;  %1225 = vst [vmem:[%s1816_s21 + $0xd8] sm:$0xff] %v1161_v2 }
 0x4d9   : > { %1226 = vst [vmem:[%s1816_s21 + $0xe0] sm:$0xff] %v1162_v4  ;;  %1227 = vst [vmem:[%s1816_s21 + $0xe8] sm:$0xff] %v1163_v34  ;;  %v1122_v43 = vpop.permute.xlu1 %1121  ;;  %v1127_v49 = vpop.permute.xlu0 %1126 }
 0x4da   : > { %v1192_v0 = vadd.f32 %v1122_v43, %v968_v56  ;;  %v1193_v55 = vadd.f32 %v1122_v43, %v969_v39  ;;  %v1194_v1 = vadd.f32 %v1127_v49, %v970_v32  ;;  %v1195_v8 = vadd.f32 %v1127_v49, %v971_v42 }
 0x4dc   : > { %1256 = vst [vmem:[%s1816_s21 + $0x1d0] sm:$0xff] %v1192_v0  ;;  %1257 = vst [vmem:[%s1816_s21 + $0x1d8] sm:$0xff] %v1193_v55 }
 0x4dd   : > { %1258 = vst [vmem:[%s1816_s21 + $0x1e0] sm:$0xff] %v1194_v1  ;;  %1259 = vst [vmem:[%s1816_s21 + $0x1e8] sm:$0xff] %v1195_v8  ;;  %v828_v26 = vpop.permute.xlu1 %827 }
 0x4de   : > { %v940_v36 = vmul.f32 %v1444_v9, %v828_v26  ;;  %v941_v54 = vmul.f32 %v1445_v37, %v828_v26 }
 0x4e1   : > { %v908_v27 = vpop.permute.xlu1 %907 }
 0x4e2   : > { %v972_v53 = vmul.f32 %v1446_v6, %v908_v27  ;;  %v973_v40 = vmul.f32 %v1447_v52, %v908_v27 }
 0x4e5   : > { %v1052_v44 = vpop.permute.xlu1 %1051 }
 0x4e6   : > { %v1164_v45 = vadd.f32 %v1052_v44, %v940_v36  ;;  %v1165_v5 = vadd.f32 %v1052_v44, %v941_v54 }
 0x4e8   : > { %1228 = vst [vmem:[%s1816_s21 + $0xf0] sm:$0xff] %v1164_v45  ;;  %1229 = vst [vmem:[%s1816_s21 + $0xf8] sm:$0xff] %v1165_v5 }
 0x4e9   : > { %v1132_v35 = vpop.permute.xlu1 %1131 }
 0x4ea   : > { %v1196_v3 = vadd.f32 %v1132_v35, %v972_v53  ;;  %v1197_v61 = vadd.f32 %v1132_v35, %v973_v40 }
 0x4ec   : > { %1260 = vst [vmem:[%s1816_s21 + $0x1f0] sm:$0xff] %v1196_v3  ;;  %1261 = vst [vmem:[%s1816_s21 + $0x1f8] sm:$0xff] %v1197_v61 }
 0x4ed PF: > { %s13_s12 = sadd.s32 1, %s1454_s12  }
 0x4ee   : > { %p10_p4 = scmp.ge.s32.totalorder %s13_s12, 4  }
 0x4f0   :  { %12 = sbr.rel (!%p10_p4) target bundleno = 1 (0x1), region = 62 }

</bundles_post_ra>
